<compile_context>
chip_gen: v7x
topology: tpu7x:2x2x1
jax: 0.10.0
libtpu: 0.0.40
codegen_flags: <defaults>
</compile_context>

<pallas_src>
import functools
import math

import jax
import jax.numpy as jnp
from jax.experimental import pallas as pl
from jax.experimental.pallas import tpu as pltpu

EPS = 1e-5  # nn.LayerNorm default


def _merge_kernel(x_ref, w_ref, b_ref, o_ref, *, n_seg, seg_cols):
    """Segmented LayerNorm (no affine; folded into W) + matmul + bias.

    x_ref: (tm, n_seg*seg_cols)  -- n_seg tokens packed per row (seg_cols = 8C)
    w_ref: (n_seg*seg_cols, out_cols)  block-diagonal when n_seg > 1
    b_ref: (1, out_cols)
    o_ref: (tm, out_cols)
    """
    x = x_ref[...].astype(jnp.float32)

    parts = []
    for j in range(n_seg):
        seg = x[:, j * seg_cols:(j + 1) * seg_cols]
        mean = jnp.mean(seg, axis=-1, keepdims=True)
        ex2 = jnp.mean(seg * seg, axis=-1, keepdims=True)
        var = jnp.maximum(ex2 - mean * mean, 0.0)          # single-pass variance
        parts.append((seg - mean) * jax.lax.rsqrt(var + EPS))
    xn = parts[0] if n_seg == 1 else jnp.concatenate(parts, axis=-1)

    y = jnp.dot(xn.astype(w_ref.dtype), w_ref[...],
                preferred_element_type=jnp.float32)
    y = y + b_ref[...].astype(jnp.float32)
    o_ref[...] = y.astype(o_ref.dtype)


def _max_row_tile(in_cols, out_cols, in_bytes, out_bytes, w_bytes,
                  budget=40 * 1024 * 1024):
    """Largest row tile whose double-buffered tiles + resident weight fit budget."""
    weight = 2 * (in_cols * out_cols * w_bytes + out_cols * 4)
    per_row = 2 * (in_cols * in_bytes + out_cols * out_bytes)
    tm = (budget - weight) // per_row
    tm = int(max(64, min(2048, tm)))
    return tm - tm % 8


def _choose_tm(n_rows, max_tm):
    """Pick the row tile: full extent if it fits (split in two for v7x's 2 TCs
    when large), else the biggest multiple of 8 <= max_tm that divides n_rows."""
    if n_rows <= max_tm:
        if n_rows > 256 and n_rows % 16 == 0:
            return n_rows // 2          # >=2 grid steps -> megacore sharding
        return n_rows
    for tm in range(max_tm, 63, -8):
        if n_rows % tm == 0:
            return tm
    return max_tm


def _fused_ln_matmul(xp, w, b, *, n_seg, seg_cols, out_dtype):
    """xp: (n_rows, n_seg*seg_cols) -> (n_rows, out_cols) via LayerNorm + matmul."""
    n_rows, in_cols = xp.shape
    out_cols = w.shape[1]

    max_tm = _max_row_tile(in_cols, out_cols,
                           xp.dtype.itemsize,
                           jnp.dtype(out_dtype).itemsize,
                           w.dtype.itemsize)
    tm = _choose_tm(n_rows, max_tm)
    n_pad = pl.cdiv(n_rows, tm) * tm
    if n_pad != n_rows:
        xp = jnp.pad(xp, ((0, n_pad - n_rows), (0, 0)))

    vmem_est = (2 * tm * (in_cols * xp.dtype.itemsize
                          + out_cols * jnp.dtype(out_dtype).itemsize)
                + 2 * (in_cols * out_cols + out_cols) * w.dtype.itemsize)
    vmem_limit = int(min(64 * 1024 * 1024,
                         max(32 * 1024 * 1024, vmem_est + (4 << 20))))

    kernel = functools.partial(_merge_kernel, n_seg=n_seg, seg_cols=seg_cols)
    out = pl.pallas_call(
        kernel,
        out_shape=jax.ShapeDtypeStruct((n_pad, out_cols), out_dtype),
        grid_spec=pltpu.PrefetchScalarGridSpec(
            num_scalar_prefetch=0,
            grid=(n_pad // tm,),
            in_specs=[
                pl.BlockSpec((tm, in_cols), lambda i: (i, 0)),        # token rows
                pl.BlockSpec((in_cols, out_cols), lambda i: (0, 0)),  # weight (resident)
                pl.BlockSpec((1, out_cols), lambda i: (0, 0)),        # folded bias
            ],
            out_specs=pl.BlockSpec((tm, out_cols), lambda i: (i, 0)),
        ),
        compiler_params=pltpu.CompilerParams(
            dimension_semantics=("parallel",),
            vmem_limit_bytes=vmem_limit,
        ),
    )(xp, w, b)

    if n_pad != n_rows:
        out = out[:n_rows]
    return out


def patch_merging_3d(x, gamma, beta, w_t):
    """x: (B, D, H, W, C) -> (B, ceil(D/2), ceil(H/2), ceil(W/2), 2C).

    gamma, beta: LayerNorm(8C) weight/bias.  w_t: (8C, 2C) = reduction.weight.T
    """
    b, d, h, w, c = x.shape
    if (h % 2) or (w % 2) or (d % 2):
        x = jnp.pad(x, ((0, 0), (0, d % 2), (0, h % 2), (0, w % 2), (0, 0)))
    d2, h2, w2 = x.shape[1] // 2, x.shape[2] // 2, x.shape[3] // 2

    # TODO(synk): the 2x2x2 gather + concat below is still materialized as an
    # (N, 8C) HBM intermediate by XLA; fusing it into the kernel (strided DMA
    # gather from the original x) would remove ~half the HBM traffic.
    x0 = x[:, 0::2, 0::2, 0::2, :]
    x1 = x[:, 1::2, 0::2, 0::2, :]
    x2 = x[:, 0::2, 1::2, 0::2, :]
    x3 = x[:, 0::2, 0::2, 1::2, :]
    x4 = x[:, 1::2, 0::2, 1::2, :]
    x5 = x[:, 0::2, 1::2, 0::2, :]   # duplicates x2 (faithful to reference)
    x6 = x[:, 0::2, 0::2, 1::2, :]   # duplicates x3 (faithful to reference)
    x7 = x[:, 1::2, 1::2, 1::2, :]
    xc = jnp.concatenate([x0, x1, x2, x3, x4, x5, x6, x7], axis=-1)  # (B,D2,H2,W2,8C)

    c8, c2 = 8 * c, 2 * c
    n_tok = b * d2 * h2 * w2

    # Fold LayerNorm affine into the reduction weight (mathematically identical).
    w_f = (gamma.reshape(-1, 1).astype(jnp.float32)
           * w_t.astype(jnp.float32)).astype(w_t.dtype)            # (8C, 2C)
    b_f = (beta.reshape(1, -1).astype(jnp.float32)
           @ w_t.astype(jnp.float32))                              # (1, 2C), f32

    # Lane-dense output: pack r tokens per row so the output last dim is a
    # multiple of 128 (avoids masked partial stores when 2C < 128).
    r = 1
    if c2 < 128 and c8 % 128 == 0:
        rr = 128 // math.gcd(c2, 128)
        if rr <= 8 and n_tok % rr == 0:
            r = rr
    if r > 1:
        w_k = jnp.kron(jnp.eye(r, dtype=w_f.dtype), w_f)   # block-diag (r*8C, r*2C)
        b_k = jnp.tile(b_f, (1, r))                         # (1, r*2C)
    else:
        w_k, b_k = w_f, b_f

    xp = xc.reshape(n_tok // r, r * c8)                     # free, row-major
    out = _fused_ln_matmul(xp, w_k, b_k, n_seg=r, seg_cols=c8, out_dtype=x.dtype)
    return out.reshape(b, d2, h2, w2, c2)


def patch_merging_3d_ref(x, gamma, beta, w_t):
    """Pure-JAX reference (same semantics) for validation."""
    b, d, h, w, c = x.shape
    if (h % 2) or (w % 2) or (d % 2):
        x = jnp.pad(x, ((0, 0), (0, d % 2), (0, h % 2), (0, w % 2), (0, 0)))
    x0 = x[:, 0::2, 0::2, 0::2, :]
    x1 = x[:, 1::2, 0::2, 0::2, :]
    x2 = x[:, 0::2, 1::2, 0::2, :]
    x3 = x[:, 0::2, 0::2, 1::2, :]
    x4 = x[:, 1::2, 0::2, 1::2, :]
    x5 = x[:, 0::2, 1::2, 0::2, :]
    x6 = x[:, 0::2, 0::2, 1::2, :]
    x7 = x[:, 1::2, 1::2, 1::2, :]
    xc = jnp.concatenate([x0, x1, x2, x3, x4, x5, x6, x7], axis=-1).astype(jnp.float32)
    mean = jnp.mean(xc, axis=-1, keepdims=True)
    var = jnp.mean((xc - mean) ** 2, axis=-1, keepdims=True)
    xn = (xc - mean) / jnp.sqrt(var + EPS)
    y = xn * gamma.reshape(-1) + beta.reshape(-1)
    return jnp.einsum("bdhwk,ko->bdhwo", y, w_t.astype(jnp.float32))


if __name__ == "__main__":
    key = jax.random.PRNGKey(0)

    configs = [
        (2, 4, 4, 4, 32),   # even dims, 2C=64<128 -> lane packing r=2
        (1, 3, 5, 4, 16),   # odd spatial dims (exercises padding), r=4 packing
        (2, 2, 4, 2, 64),   # 2C=128 -> no packing (r=1) path
    ]
    for idx, (B, D, H, W, dim) in enumerate(configs):
        kk = jax.random.fold_in(key, idx)
        k_x, k_w = jax.random.split(kk)
        x = jax.random.normal(k_x, (B, D, H, W, dim), dtype=jnp.float32)
        # LayerNorm(8*dim) affine (non-trivial, deterministic) and
        # Linear(8*dim -> 2*dim, bias=False) weight; kernel consumes W^T (in, out).
        gamma = jnp.linspace(0.5, 1.5, 8 * dim, dtype=jnp.float32)
        beta = jnp.linspace(-0.2, 0.2, 8 * dim, dtype=jnp.float32)
        w = jax.random.normal(k_w, (2 * dim, 8 * dim), dtype=jnp.float32) * 0.02
        w_t = w.T

        out = jax.block_until_ready(patch_merging_3d(x, gamma, beta, w_t))
        ref = patch_merging_3d_ref(x, gamma, beta, w_t)

        d2, h2, w2 = (D + D % 2) // 2, (H + H % 2) // 2, (W + W % 2) // 2
        assert out.shape == (B, d2, h2, w2, 2 * dim), out.shape
        err = float(jnp.abs(out - ref).max())
        assert jnp.allclose(out, ref, atol=2e-4, rtol=2e-4), (idx, err)

    print("KERNEL_OK")
</pallas_src>

<mosaic_0001>
module attributes {stable_mosaic.version = 11 : i64} {
  func.func @_merge_kernel(%arg0: i32, %arg1: memref<8x512xf32, #tpu.memory_space<vmem>>, %arg2: memref<512x128xf32, #tpu.memory_space<vmem>>, %arg3: memref<1x128xf32, #tpu.memory_space<vmem>>, %arg4: memref<8x128xf32, #tpu.memory_space<vmem>>) attributes {dimension_semantics = [#tpu.dimension_semantics<parallel>], iteration_bounds = array<i64: 1>, scalar_prefetch = 0 : i64, scratch_operands = 0 : i64, tpu.core_type = #tpu.core_type<tc>, window_params = [{transform_indices = @transform_0, window_bounds = array<i64: 8, 512>}, {pipeline_mode = #tpu.pipeline_mode<synchronous>, transform_indices = @transform_1, window_bounds = array<i64: 512, 128>}, {pipeline_mode = #tpu.pipeline_mode<synchronous>, transform_indices = @transform_2, window_bounds = array<i64: 1, 128>}, {transform_indices = @transform_3, window_bounds = array<i64: 8, 128>}]} {
    %c0 = arith.constant 0 : index
    %c0_0 = arith.constant 0 : index
    %0 = vector.load %arg1[%c0, %c0_0] : memref<8x512xf32, #tpu.memory_space<vmem>>, vector<8x512xf32>
    %1 = vector.extract_strided_slice %0 {offsets = [0, 0], sizes = [8, 256], strides = [1, 1]} : vector<8x512xf32> to vector<8x256xf32>
    %cst = arith.constant dense<0.000000e+00> : vector<8xf32>
    %2 = vector.multi_reduction <add>, %1, %cst [1] : vector<8x256xf32> to vector<8xf32>
    %3 = vector.shape_cast %2 : vector<8xf32> to vector<8x1xf32>
    %cst_1 = arith.constant 2.560000e+02 : f32
    %4 = vector.broadcast %cst_1 : f32 to vector<8x1xf32>
    %5 = arith.divf %3, %4 : vector<8x1xf32>
    %6 = arith.mulf %1, %1 : vector<8x256xf32>
    %cst_2 = arith.constant dense<0.000000e+00> : vector<8xf32>
    %7 = vector.multi_reduction <add>, %6, %cst_2 [1] : vector<8x256xf32> to vector<8xf32>
    %8 = vector.shape_cast %7 : vector<8xf32> to vector<8x1xf32>
    %cst_3 = arith.constant 2.560000e+02 : f32
    %9 = vector.broadcast %cst_3 : f32 to vector<8x1xf32>
    %10 = arith.divf %8, %9 : vector<8x1xf32>
    %11 = arith.mulf %5, %5 : vector<8x1xf32>
    %12 = arith.subf %10, %11 : vector<8x1xf32>
    %cst_4 = arith.constant 0.000000e+00 : f32
    %13 = vector.broadcast %cst_4 : f32 to vector<8x1xf32>
    %14 = arith.maximumf %12, %13 : vector<8x1xf32>
    %15 = vector.broadcast %5 : vector<8x1xf32> to vector<8x256xf32>
    %16 = arith.subf %1, %15 : vector<8x256xf32>
    %cst_5 = arith.constant 9.99999974E-6 : f32
    %17 = vector.broadcast %cst_5 : f32 to vector<8x1xf32>
    %18 = arith.addf %14, %17 : vector<8x1xf32>
    %19 = math.rsqrt %18 : vector<8x1xf32>
    %20 = vector.broadcast %19 : vector<8x1xf32> to vector<8x256xf32>
    %21 = arith.mulf %16, %20 : vector<8x256xf32>
    %22 = vector.extract_strided_slice %0 {offsets = [0, 256], sizes = [8, 256], strides = [1, 1]} : vector<8x512xf32> to vector<8x256xf32>
    %cst_6 = arith.constant dense<0.000000e+00> : vector<8xf32>
    %23 = vector.multi_reduction <add>, %22, %cst_6 [1] : vector<8x256xf32> to vector<8xf32>
    %24 = vector.shape_cast %23 : vector<8xf32> to vector<8x1xf32>
    %cst_7 = arith.constant 2.560000e+02 : f32
    %25 = vector.broadcast %cst_7 : f32 to vector<8x1xf32>
    %26 = arith.divf %24, %25 : vector<8x1xf32>
    %27 = arith.mulf %22, %22 : vector<8x256xf32>
    %cst_8 = arith.constant dense<0.000000e+00> : vector<8xf32>
    %28 = vector.multi_reduction <add>, %27, %cst_8 [1] : vector<8x256xf32> to vector<8xf32>
    %29 = vector.shape_cast %28 : vector<8xf32> to vector<8x1xf32>
    %cst_9 = arith.constant 2.560000e+02 : f32
    %30 = vector.broadcast %cst_9 : f32 to vector<8x1xf32>
    %31 = arith.divf %29, %30 : vector<8x1xf32>
    %32 = arith.mulf %26, %26 : vector<8x1xf32>
    %33 = arith.subf %31, %32 : vector<8x1xf32>
    %cst_10 = arith.constant 0.000000e+00 : f32
    %34 = vector.broadcast %cst_10 : f32 to vector<8x1xf32>
    %35 = arith.maximumf %33, %34 : vector<8x1xf32>
    %36 = vector.broadcast %26 : vector<8x1xf32> to vector<8x256xf32>
    %37 = arith.subf %22, %36 : vector<8x256xf32>
    %cst_11 = arith.constant 9.99999974E-6 : f32
    %38 = vector.broadcast %cst_11 : f32 to vector<8x1xf32>
    %39 = arith.addf %35, %38 : vector<8x1xf32>
    %40 = math.rsqrt %39 : vector<8x1xf32>
    %41 = vector.broadcast %40 : vector<8x1xf32> to vector<8x256xf32>
    %42 = arith.mulf %37, %41 : vector<8x256xf32>
    %43 = tpu.concatenate %21, %42 in 1 : vector<8x256xf32>, vector<8x256xf32> -> vector<8x512xf32>
    %c0_12 = arith.constant 0 : index
    %c0_13 = arith.constant 0 : index
    %44 = vector.load %arg2[%c0_12, %c0_13] : memref<512x128xf32, #tpu.memory_space<vmem>>, vector<512x128xf32>
    %cst_14 = arith.constant dense<0.000000e+00> : vector<8x128xf32>
    %45 = tpu.matmul %43, %44, %cst_14 {dimension_numbers = #tpu.dot_dimension_numbers<[1], [0], [0], [1], [0, 0, 1, 1], [], []>} : vector<8x512xf32>, vector<512x128xf32>, vector<8x128xf32> -> vector<8x128xf32>
    %c0_15 = arith.constant 0 : index
    %c0_16 = arith.constant 0 : index
    %46 = vector.load %arg3[%c0_15, %c0_16] : memref<1x128xf32, #tpu.memory_space<vmem>>, vector<1x128xf32>
    %47 = vector.broadcast %46 : vector<1x128xf32> to vector<8x128xf32>
    %48 = arith.addf %45, %47 : vector<8x128xf32>
    %c0_17 = arith.constant 0 : index
    %c0_18 = arith.constant 0 : index
    %49 = vector.load %arg4[%c0_17, %c0_18] : memref<8x128xf32, #tpu.memory_space<vmem>>, vector<8x128xf32>
    tpu.vector_store %arg4[%c0_17, %c0_18], %48 {strides = array<i32>} : memref<8x128xf32, #tpu.memory_space<vmem>>, vector<8x128xf32>,
    return
  }
  func.func @transform_0(%arg0: i32) -> (i32, i32) {
    %c0_i32 = arith.constant 0 : i32
    %c0_i32_0 = arith.constant 0 : i32
    return %arg0, %c0_i32 : i32, i32
  }
  func.func @transform_1(%arg0: i32) -> (i32, i32) {
    %c0_i32 = arith.constant 0 : i32
    %c0_i32_0 = arith.constant 0 : i32
    %c0_i32_1 = arith.constant 0 : i32
    return %c0_i32, %c0_i32_0 : i32, i32
  }
  func.func @transform_2(%arg0: i32) -> (i32, i32) {
    %c0_i32 = arith.constant 0 : i32
    %c0_i32_0 = arith.constant 0 : i32
    %c0_i32_1 = arith.constant 0 : i32
    return %c0_i32, %c0_i32_0 : i32, i32
  }
  func.func @transform_3(%arg0: i32) -> (i32, i32) {
    %c0_i32 = arith.constant 0 : i32
    %c0_i32_0 = arith.constant 0 : i32
    return %arg0, %c0_i32 : i32, i32
  }
}

</mosaic_0001>

<bundles_post_ra>
// kernel: tpu_custom_call.1
= control target key start
LH: loop header
LB: loop body
LE: loop exit
PB: predicated region body
PF: predicated region fallthrough
CT: control target
= control target key end

     0   :  { %8 = vsyncpa [#allocation3], 0  ;;  %s623_s0 = inlined_call_operand.hbm [shape: f32[8,512], index: 0, kind: input, shape index: {}]   ;;  %s624_s1 = inlined_call_operand.hbm [shape: f32[512,128], index: 1, kind: input, shape index: {}]   ;;  %s625_s2 = inlined_call_operand.vmem [shape: f32[1,128], index: 2, kind: input, shape index: {}]   ;;  %s626_s3 = inlined_call_operand.hbm [shape: f32[8,128], index: 3, kind: output, shape index: {}]  }
   0x1   :  { %9 = vsyncpa [#allocation6], 0 }
   0x2   :  { %10 = vsyncpa [#allocation4], 0  ;;  %s528_s12 = smov [#allocation2]   ;;  %s529_s14 = smov [#allocation5]  }
   0x3   :  { %s17_s13 = sshll.u32 %s528_s12, 4  ;;  %s26_s15 = sshll.u32 %s529_s14, 4  ;;  %s18_s13 = int_to_ptr.vmem [resolvable:$true] %s17_s13  ;;  %s553_s15 = int_to_ptr.vmem [resolvable:$true] %s26_s15 }
   0x4   :  { %s456_s18 = scalar_lea.hbm %s623_s0, 512 }
   0x5   :  { %p457_p0 = scmp.ne.s32.totalorder %s623_s0, %s456_s18  ;;  %p460_p1 = scmp.lt.u32.totalorder %s456_s18, %s623_s0 }
   0x7   :  { %p462_p2 = pnand %p460_p1, %p457_p0 }
   0x9   :  { %465 = shalt.err (!%p462_p2)
}
   0xa   :  { %s466_s23 = scalar_lea.vmem %s18_s13, 512  ;;  %p471_p4 = scmp.lt.s32.totalorder %s18_s13, %s18_s13 }
   0xb   :  { %p467_p3 = scmp.ne.s32.totalorder %s18_s13, %s466_s23  ;;  %p472_p5 = scmp.lt.s32.totalorder %s466_s23, %s466_s23 }
   0xd   :  { %p473_p6 = por %p472_p5, %p471_p4 }
   0xf   :  { %p474_p7 = pnand %p473_p6, %p467_p3 }
  0x11   :  { %477 = shalt.err (!%p474_p7)
}
  0x12   :  { %20 = dma.hbm_to_vmem [thread:$0]  %s623_s0, 512, %s18_s13, [#allocation3]  }
  0x13   :  { %s478_s28 = scalar_lea.hbm %s624_s1, 8192 }
  0x14   :  { %p479_p8 = scmp.ne.s32.totalorder %s624_s1, %s478_s28  ;;  %p482_p9 = scmp.lt.u32.totalorder %s478_s28, %s624_s1 }
  0x16   :  { %p484_p10 = pnand %p482_p9, %p479_p8 }
  0x18   :  { %487 = shalt.err (!%p484_p10)
}
  0x19   :  { %s488_s6 = scalar_lea.vmem %s553_s15, 8192  ;;  %p493_p12 = scmp.lt.s32.totalorder %s553_s15, %s553_s15 }
  0x1a   :  { %p489_p11 = scmp.ne.s32.totalorder %s553_s15, %s488_s6  ;;  %p494_p13 = scmp.lt.s32.totalorder %s488_s6, %s488_s6 }
  0x1c   :  { %p495_p0 = por %p494_p13, %p493_p12 }
  0x1e   :  { %p496_p1 = pnand %p495_p0, %p489_p11 }
  0x20   :  { %499 = shalt.err (!%p496_p1)
}
  0x21   :  { %s530_s0 = smov 128   ;;  %s531_s7 = smov 8  }
  0x22   :  { %32 = dma.hbm_to_vmem [thread:$0]  %s624_s1, 8192, %s553_s15, [#allocation6], %s530_s0, %s530_s0, %s531_s7  }
  0x23   :  { %522 = dma.done.wait [#allocation3], 512  }
  0x24   :  { %523 = vsyncadd [#allocation3], 4294966784 }
  0x25   :  { %524 = dma.done.wait [#allocation6], 8192  }
  0x26   :  { %525 = vsyncadd [#allocation6], 4294959104  ;;  %v584_v0 = vld [vmem:[#allocation2 + $0x10] sm:$0xff]  ;;  %v586_v1 = vld [vmem:[#allocation2 + $0x18] sm:$0xff]  ;;  %s532_s11 = smov [#allocation7]  }
  0x27   :  { %v588_v2 = vld [vmem:[#allocation2] sm:$0xff]  ;;  %v65_v3 = vadd.f32 %v586_v1, %v584_v0  ;;  %v592_v4 = vld [vmem:[#allocation2 + $0x8] sm:$0xff]  ;;  %v69_v5 = vmul.f32 %v584_v0, %v584_v0  ;;  %v70_v6 = vmul.f32 %v586_v1, %v586_v1  ;;  %v102_v24 = vld [vmem:[#allocation5 + $0x90] sm:$0xff]  ;;  %s302_s12 = sshll.u32 %s532_s11, 4  ;;  %s303_s12 = int_to_ptr.vmem [resolvable:$true] %s302_s12 }
  0x28   :  { %v50_v7 = vmul.f32 %v588_v2, %v588_v2  ;;  %v100_v8 = vld [vmem:[#allocation5 + $0x80] sm:$0xff]  ;;  %v101_v9 = vld [vmem:[#allocation5 + $0x88] sm:$0xff]  ;;  %v45_v10 = vadd.f32 %v592_v4, %v588_v2  ;;  %v51_v11 = vmul.f32 %v592_v4, %v592_v4  ;;  %v103_v25 = vld [vmem:[#allocation5 + $0x98] sm:$0xff]  ;;  %s500_s13 = scalar_lea.vmem %s303_s12, 128  ;;  %p505_p3 = scmp.lt.s32.totalorder %s303_s12, %s303_s12 }
  0x29   :  { %v383_v12 = vpack.c.bf16 %v101_v9, %v100_v8  ;;  %v132_v13 = vld [vmem:[#allocation5 + $0x180] sm:$0xff]  ;;  %v133_v14 = vld [vmem:[#allocation5 + $0x188] sm:$0xff]  ;;  %66 = vadd.xlane.f32.xlu1 %v65_v3  ;;  %v71_v16 = vadd.f32 %v70_v6, %v69_v5  ;;  %v134_v26 = vld [vmem:[#allocation5 + $0x190] sm:$0xff]  ;;  %v387_v27 = vpack.c.bf16 %v103_v25, %v102_v24  ;;  %p501_p2 = scmp.ne.s32.totalorder %s303_s12, %s500_s13  ;;  %p506_p4 = scmp.lt.s32.totalorder %s500_s13, %s500_s13 }
  0x2a   :  { %v84_v15 = vld [vmem:[#allocation5] sm:$0xff]  ;;  %v415_v17 = vpack.c.bf16 %v133_v14, %v132_v13  ;;  %v85_v18 = vld [vmem:[#allocation5 + $0x8] sm:$0xff]  ;;  %46 = vadd.xlane.f32.xlu0 %v45_v10  ;;  %v52_v21 = vadd.f32 %v51_v11, %v50_v7  ;;  %v135_v28 = vld [vmem:[#allocation5 + $0x198] sm:$0xff] }
  0x2b   :  { %v116_v19 = vld [vmem:[#allocation5 + $0x100] sm:$0xff]  ;;  %v117_v20 = vld [vmem:[#allocation5 + $0x108] sm:$0xff]  ;;  %384 = vmatprep.subr.bf16.mxu0 %v383_v12  ;;  %v385_v22 = vpack.c.bf16 %v85_v18, %v84_v15  ;;  %v86_v29 = vld [vmem:[#allocation5 + $0x10] sm:$0xff]  ;;  %v419_v31 = vpack.c.bf16 %v135_v28, %v134_v26  ;;  %p507_p5 = por %p506_p4, %p505_p3 }
  0x2c   :  { %v417_v23 = vpack.c.bf16 %v117_v20, %v116_v19  ;;  %416 = vmatprep.subr.bf16.mxu1 %v415_v17  ;;  %v87_v30 = vld [vmem:[#allocation5 + $0x18] sm:$0xff]  ;;  %v118_v33 = vld [vmem:[#allocation5 + $0x110] sm:$0xff]  ;;  %v104_v36 = vld [vmem:[#allocation5 + $0xa0] sm:$0xff] }
  0x2d   :  { %386 = vmatpush3.bf16.msra.mxu0 %v385_v22  ;;  %v389_v32 = vpack.c.bf16 %v87_v30, %v86_v29  ;;  %v119_v34 = vld [vmem:[#allocation5 + $0x118] sm:$0xff]  ;;  %72 = vadd.xlane.f32.xlu1 %v71_v16  ;;  %v105_v37 = vld [vmem:[#allocation5 + $0xa8] sm:$0xff]  ;;  %v136_v38 = vld [vmem:[#allocation5 + $0x1a0] sm:$0xff]  ;;  %p508_p6 = pnand %p507_p5, %p501_p2 }
  0x2e   :  { %418 = vmatpush3.bf16.msra.mxu1 %v417_v23  ;;  %388 = vmatprep.subr.bf16.mxu0 %v387_v27  ;;  %v421_v35 = vpack.c.bf16 %v119_v34, %v118_v33  ;;  %v391_v39 = vpack.c.bf16 %v105_v37, %v104_v36  ;;  %v137_v40 = vld [vmem:[#allocation5 + $0x1a8] sm:$0xff]  ;;  %v88_v41 = vld [vmem:[#allocation5 + $0x20] sm:$0xff]  ;;  %v106_v48 = vld [vmem:[#allocation5 + $0xb0] sm:$0xff] }
  0x2f   :  { %53 = vadd.xlane.f32.xlu0 %v52_v21  ;;  %420 = vmatprep.subr.bf16.mxu1 %v419_v31  ;;  %v89_v42 = vld [vmem:[#allocation5 + $0x28] sm:$0xff]  ;;  %v423_v43 = vpack.c.bf16 %v137_v40, %v136_v38  ;;  %v120_v45 = vld [vmem:[#allocation5 + $0x120] sm:$0xff]  ;;  %v107_v49 = vld [vmem:[#allocation5 + $0xb8] sm:$0xff] }
  0x30   :  { %v393_v44 = vpack.c.bf16 %v89_v42, %v88_v41  ;;  %v121_v46 = vld [vmem:[#allocation5 + $0x128] sm:$0xff]  ;;  %v138_v50 = vld [vmem:[#allocation5 + $0x1b0] sm:$0xff]  ;;  %v395_v51 = vpack.c.bf16 %v107_v49, %v106_v48  ;;  %v139_v52 = vld [vmem:[#allocation5 + $0x1b8] sm:$0xff] }
  0x31   :  { %390 = vmatpush3.bf16.msra.mxu0 %v389_v32  ;;  %v425_v47 = vpack.c.bf16 %v121_v46, %v120_v45  ;;  %v90_v53 = vld [vmem:[#allocation5 + $0x30] sm:$0xff]  ;;  %v91_v54 = vld [vmem:[#allocation5 + $0x38] sm:$0xff]  ;;  %v427_v55 = vpack.c.bf16 %v139_v52, %v138_v50  ;;  %v108_v60 = vld [vmem:[#allocation5 + $0xc0] sm:$0xff] }
  0x32   :  { %422 = vmatpush3.bf16.msra.mxu1 %v421_v35  ;;  %392 = vmatprep.subr.bf16.mxu0 %v391_v39  ;;  %v397_v56 = vpack.c.bf16 %v91_v54, %v90_v53  ;;  %v122_v57 = vld [vmem:[#allocation5 + $0x130] sm:$0xff]  ;;  %v123_v58 = vld [vmem:[#allocation5 + $0x138] sm:$0xff]  ;;  %v109_v61 = vld [vmem:[#allocation5 + $0xc8] sm:$0xff] }
  0x33   :  { %424 = vmatprep.subr.bf16.mxu1 %v423_v43  ;;  %v429_v59 = vpack.c.bf16 %v123_v58, %v122_v57  ;;  %v140_v62 = vld [vmem:[#allocation5 + $0x1c0] sm:$0xff]  ;;  %v399_v63 = vpack.c.bf16 %v109_v61, %v108_v60  ;;  %v141_v3 = vld [vmem:[#allocation5 + $0x1c8] sm:$0xff]  ;;  %v110_v12 = vld [vmem:[#allocation5 + $0xd0] sm:$0xff] }
  0x34   :  { %v92_v5 = vld [vmem:[#allocation5 + $0x40] sm:$0xff]  ;;  %v93_v6 = vld [vmem:[#allocation5 + $0x48] sm:$0xff]  ;;  %v431_v7 = vpack.c.bf16 %v141_v3, %v140_v62  ;;  %v111_v13 = vld [vmem:[#allocation5 + $0xd8] sm:$0xff] }
  0x35   :  { %394 = vmatpush3.bf16.msra.mxu0 %v393_v44  ;;  %v401_v8 = vpack.c.bf16 %v93_v6, %v92_v5  ;;  %v124_v9 = vld [vmem:[#allocation5 + $0x140] sm:$0xff]  ;;  %v125_v10 = vld [vmem:[#allocation5 + $0x148] sm:$0xff]  ;;  %v142_v14 = vld [vmem:[#allocation5 + $0x1d0] sm:$0xff]  ;;  %v403_v15 = vpack.c.bf16 %v111_v13, %v110_v12 }
  0x36   :  { %426 = vmatpush3.bf16.msra.mxu1 %v425_v47  ;;  %396 = vmatprep.subr.bf16.mxu0 %v395_v51  ;;  %v433_v11 = vpack.c.bf16 %v125_v10, %v124_v9  ;;  %v143_v16 = vld [vmem:[#allocation5 + $0x1d8] sm:$0xff]  ;;  %v94_v17 = vld [vmem:[#allocation5 + $0x50] sm:$0xff]  ;;  %v112_v23 = vld [vmem:[#allocation5 + $0xe0] sm:$0xff] }
  0x37   :  { %428 = vmatprep.subr.bf16.mxu1 %v427_v55  ;;  %v95_v18 = vld [vmem:[#allocation5 + $0x58] sm:$0xff]  ;;  %v435_v19 = vpack.c.bf16 %v143_v16, %v142_v14  ;;  %v126_v21 = vld [vmem:[#allocation5 + $0x150] sm:$0xff]  ;;  %v113_v25 = vld [vmem:[#allocation5 + $0xe8] sm:$0xff] }
  0x38   :  { %v405_v20 = vpack.c.bf16 %v95_v18, %v94_v17  ;;  %v127_v22 = vld [vmem:[#allocation5 + $0x158] sm:$0xff]  ;;  %v144_v26 = vld [vmem:[#allocation5 + $0x1e0] sm:$0xff]  ;;  %v145_v27 = vld [vmem:[#allocation5 + $0x1e8] sm:$0xff]  ;;  %v407_v28 = vpack.c.bf16 %v113_v25, %v112_v23 }
  0x39   :  { %398 = vmatpush3.bf16.msra.mxu0 %v397_v56  ;;  %v437_v24 = vpack.c.bf16 %v127_v22, %v126_v21  ;;  %v439_v29 = vpack.c.bf16 %v145_v27, %v144_v26  ;;  %v96_v30 = vld [vmem:[#allocation5 + $0x60] sm:$0xff]  ;;  %v97_v31 = vld [vmem:[#allocation5 + $0x68] sm:$0xff]  ;;  %v114_v35 = vld [vmem:[#allocation5 + $0xf0] sm:$0xff] }
  0x3a   :  { %430 = vmatpush3.bf16.msra.mxu1 %v429_v59  ;;  %400 = vmatprep.subr.bf16.mxu0 %v399_v63  ;;  %v128_v32 = vld [vmem:[#allocation5 + $0x160] sm:$0xff]  ;;  %v409_v33 = vpack.c.bf16 %v97_v31, %v96_v30  ;;  %v129_v34 = vld [vmem:[#allocation5 + $0x168] sm:$0xff]  ;;  %v115_v36 = vld [vmem:[#allocation5 + $0xf8] sm:$0xff] }
  0x3b   :  { %432 = vmatprep.subr.bf16.mxu1 %v431_v7  ;;  %v441_v37 = vpack.c.bf16 %v129_v34, %v128_v32  ;;  %v411_v38 = vpack.c.bf16 %v115_v36, %v114_v35  ;;  %v146_v39 = vld [vmem:[#allocation5 + $0x1f0] sm:$0xff]  ;;  %v147_v40 = vld [vmem:[#allocation5 + $0x1f8] sm:$0xff] }
  0x3c   :  { %v98_v41 = vld [vmem:[#allocation5 + $0x70] sm:$0xff]  ;;  %v443_v42 = vpack.c.bf16 %v147_v40, %v146_v39  ;;  %v99_v43 = vld [vmem:[#allocation5 + $0x78] sm:$0xff] }
  0x3d   :  { %402 = vmatpush3.bf16.msra.mxu0 %v401_v8  ;;  %v130_v44 = vld [vmem:[#allocation5 + $0x170] sm:$0xff]  ;;  %v131_v45 = vld [vmem:[#allocation5 + $0x178] sm:$0xff]  ;;  %v413_v46 = vpack.c.bf16 %v99_v43, %v98_v41 }
  0x3e   :  { %434 = vmatpush3.bf16.msra.mxu1 %v433_v11  ;;  %404 = vmatprep.subr.bf16.mxu0 %v403_v15  ;;  %v445_v47 = vpack.c.bf16 %v131_v45, %v130_v44 }
  0x3f   :  { %436 = vmatprep.subr.bf16.mxu1 %v435_v19 }
  0x41   :  { %406 = vmatpush3.bf16.msra.mxu0 %v405_v20 }
  0x42   :  { %438 = vmatpush3.bf16.msra.mxu1 %v437_v24  ;;  %408 = vmatprep.subr.bf16.mxu0 %v407_v28 }
  0x43   :  { %440 = vmatprep.subr.bf16.mxu1 %v439_v29 }
  0x45   :  { %410 = vmatpush3.bf16.msra.mxu0 %v409_v33 }
  0x46   :  { %442 = vmatpush3.bf16.msra.mxu1 %v441_v37  ;;  %412 = vmatprep.subr.bf16.mxu0 %v411_v38 }
  0x47   :  { %444 = vmatprep.subr.bf16.mxu1 %v443_v42 }
  0x49   :  { %414 = vmatpush3.bf16.msra.mxu0 %v413_v46 }
  0x4a   :  { %446 = vmatpush3.bf16.msra.mxu1 %v445_v47 }
  0xb6   :  { %v67_v48 = vpop.xlane.xlu1 %66 }
  0xb7   :  { %v68_v49 = vmul.f32 0.00390625, %v67_v48  ;;  %v47_v50 = vpop.xlane.xlu0 %46 }
  0xb8   :  { %v49_v51 = vmul.f32 0.00390625, %v47_v50 }
  0xb9   :  { %v75_v52 = vmul.f32 %v68_v49, %v68_v49  ;;  %v78_v3 = vsub.f32 %v584_v0, %v68_v49  ;;  %v79_v5 = vsub.f32 %v586_v1, %v68_v49  ;;  %v312_v0 = vld [vmem:[%s625_s2] ss:$0 sm:$0xff] }
  0xba   :  { %v73_v53 = vpop.xlane.xlu1 %72  ;;  %v56_v56 = vmul.f32 %v49_v51, %v49_v51  ;;  %v59_v7 = vsub.f32 %v588_v2, %v49_v51  ;;  %v60_v8 = vsub.f32 %v592_v4, %v49_v51 }
  0xbb   :  { %v74_v54 = vmul.f32 0.00390625, %v73_v53 }
  0xbc   :  { %v54_v55 = vpop.xlane.xlu0 %53 }
  0xbd   :  { %v55_v57 = vmul.f32 0.00390625, %v54_v55  ;;  %v76_v58 = vsub.f32 %v74_v54, %v75_v52 }
  0xbf   :  { %v57_v59 = vsub.f32 %v55_v57, %v56_v56  ;;  %v77_v60 = vmax.f32 %v76_v58, 0.0 }
  0xc1   :  { %v58_v61 = vmax.f32 %v57_v59, 0.0  ;;  %v80_v62 = vadd.f32 1e-05, %v77_v60 }
  0xc3   :  { %v61_v63 = vadd.f32 1e-05, %v58_v61  ;;  %452 = vrsqrt.f32 %v80_v62 }
  0xc5   :  { %454 = vrsqrt.f32 %v61_v63 }
  0xcd   :  { %v453_v6 = vpop.eup %452 }
  0xce   :  { %v83_v10 = vmul.f32 %v453_v6, %v79_v5  ;;  %v82_v11 = vmul.f32 %v453_v6, %v78_v3 }
  0xcf   :  { %v455_v9 = vpop.eup %454 }
  0xd0   :  { %v64_v12 = vmul.f32 %v455_v9, %v60_v8  ;;  %v63_v13 = vmul.f32 %v455_v9, %v59_v7  ;;  %289 = vmatprep.mubr.f32.mxu1 %v83_v10 }
  0xd1   :  { %290 = vmatmul.mubr.f32.vlgmr.msra.gmra.mrb[0].mxu1 %v82_v11 }
  0xd2   :  { %219 = vmatprep.mubr.f32.mxu0 %v64_v12 }
  0xd3   :  { %220 = vmatmul.mubr.f32.vlgmr.msra.gmra.mrb[0].mxu0 %v63_v13 }
 0x1a4   :  { %v380_v14 = vpop.f32.mrb[0].mxu1 }
 0x1a5   :  { %v381_v16 = vpop.f32.mrb[1].mxu1 }
 0x1a6   :  { %v345_v15 = vpop.f32.mrb[0].mxu0  ;;  %v382_v2 = vadd.f32 %v381_v16, %v380_v14 }
 0x1a7   :  { %v346_v1 = vpop.f32.mrb[1].mxu0 }
 0x1a8   :  { %v347_v17 = vadd.f32 %v346_v1, %v345_v15 }
 0x1aa   :  { %v222_v4 = vadd.f32 %v347_v17, %v312_v0 }
 0x1ac   :  { %v292_v18 = vadd.f32 %v382_v2, %v222_v4 }
 0x1ae   :  { %295 = vst [vmem:[#allocation7] sm:$0xff] %v292_v18 }
 0x1af   :  { %511 = shalt.err (!%p508_p6)
}
 0x1b0   :  { %s512_s2 = scalar_lea.hbm %s626_s3, 128 }
 0x1b1   :  { %p513_p7 = scmp.ne.s32.totalorder %s626_s3, %s512_s2  ;;  %p516_p8 = scmp.lt.u32.totalorder %s512_s2, %s626_s3 }
 0x1b3   :  { %p518_p9 = pnand %p516_p8, %p513_p7 }
 0x1b5   :  { %521 = shalt.err (!%p518_p9)
}
 0x1b6   :  { %305 = dma.vmem_to_hbm [thread:$0]  %s303_s12, 128, %s626_s3, [#allocation4]  }
 0x1b7   :  { %526 = dma.done.wait [#allocation4], 128  }
 0x1b8   :  { %527 = vsyncadd [#allocation4], 4294967168 }
 0x1b9   :  { %309 = vsyncpa [#allocation3], 1 }
 0x1ba   :  { %310 = vsyncpa [#allocation6], 1 }
 0x1bb   :  { %311 = vsyncpa [#allocation4], 1 }

</bundles_post_ra>
